<compile_context>
chip_gen: v7x
topology: tpu7x:2x2x1
jax: 0.10.0
libtpu: 0.0.40
codegen_flags: <defaults>
</compile_context>

<pallas_src>
import jax
import jax.numpy as jnp
from jax import lax
from jax.experimental import pallas as pl
from jax.experimental.pallas import tpu as pltpu
import numpy as np

LANE = 128  # lane-padded feature width -> unmasked full-vreg loads/stores


def _round_up(x, m):
    return ((x + m - 1) // m) * m


# ----------------------------- Pallas kernel ------------------------------
def make_tree_kernel(n_leaf_pad, level_w, n_levels, n_rows, unroll_cap=32):
    def tree_rnn_kernel(lidx_ref, ridx_ref, init_ref, wl_ref, wr_ref, b_ref,
                        states_ref):
        # Phase 0: one lane-dense slab copy of the host-built init table
        # (leaf rows filled, internal rows zero).  Zero internal rows are
        # REQUIRED for correctness of the one-hot gather below.
        states_ref[...] = init_ref[...]

        # Hoisted out of the level loop (feedback: no per-level broadcasts /
        # reloads; JAX does not CSE broadcast_in_dim).
        wl = wl_ref[...]                                    # (LANE, LANE)
        wr = wr_ref[...]                                    # (LANE, LANE)
        bias = jnp.broadcast_to(b_ref[...], (level_w, LANE))
        col_ids = lax.broadcasted_iota(jnp.int32, (level_w, n_rows), 1)

        def level_body(lv):
            # (level_w, 1) int32 index columns for this wavefront level.
            lidx = lidx_ref[lv]
            ridx = ridx_ref[lv]

            # One-hot gather on the MXU: onehot[j, r] = (child_idx[j] == r).
            onehot_l = (col_ids == lidx).astype(jnp.float32)
            onehot_r = (col_ids == ridx).astype(jnp.float32)
            st = states_ref[...]                            # (n_rows, LANE)
            left = jnp.dot(onehot_l, st, preferred_element_type=jnp.float32)
            right = jnp.dot(onehot_r, st, preferred_element_type=jnp.float32)

            # Fused level update: h = tanh([l | r] @ W.T + b) for the whole
            # wavefront, as two (W,128)x(128,128) MXU matmuls + EUP tanh.
            h = jnp.tanh(
                jnp.dot(left, wl, preferred_element_type=jnp.float32)
                + jnp.dot(right, wr, preferred_element_type=jnp.float32)
                + bias)

            if isinstance(lv, int):                         # unrolled path
                row0 = n_leaf_pad + lv * level_w
            else:                                           # fori path
                row0 = pl.multiple_of(n_leaf_pad + lv * level_w, 8)
            states_ref[pl.ds(row0, level_w), :] = h.astype(states_ref.dtype)

        if n_levels <= unroll_cap:
            # Fully unrolled: LLO scheduler can overlap next level's one-hot
            # construction with the previous level's MXU drain / tanh.
            for lv in range(n_levels):
                level_body(lv)
        else:
            def body(lv, carry):
                level_body(lv)
                return carry
            lax.fori_loop(0, n_levels, body, 0)

    return tree_rnn_kernel


def run_tree_rnn(leaf_words, left_new, right_new, n_leaf_pad, level_w,
                 n_levels, emb, fc_w, fc_b):
    """Runs the recursive-NN hot path in a single Pallas invocation."""
    d = emb.shape[1]
    assert d <= LANE, "hidden size must fit in one lane-padded vreg row"
    n_leaves = leaf_words.shape[0]
    n_rows = n_leaf_pad + n_levels * level_w

    # Batched leaf embedding gather OUTSIDE the kernel (one XLA gather), then
    # the full state table: leaf rows filled, internal rows zero.
    leaf_emb = jnp.take(jnp.asarray(emb, jnp.float32), leaf_words, axis=0)
    init_states = jnp.zeros((n_rows, LANE), jnp.float32)
    init_states = init_states.at[:n_leaves, :d].set(leaf_emb)

    # Lane-padded split weights:  y = l @ Wl + r @ Wr + b.  Zero rows/cols
    # keep the padding lanes of every state row exactly zero (tanh(0) == 0).
    w_t = jnp.asarray(fc_w, jnp.float32).T                   # (2D, D)
    wl_pad = jnp.zeros((LANE, LANE), jnp.float32).at[:d, :d].set(w_t[:d])
    wr_pad = jnp.zeros((LANE, LANE), jnp.float32).at[:d, :d].set(w_t[d:2 * d])
    b_pad = jnp.zeros((1, LANE), jnp.float32).at[0, :d].set(
        jnp.asarray(fc_b, jnp.float32))

    # Child indices as sublane-oriented columns in VMEM (no SMEM scalar loads
    # in the hot path).
    lidx = jnp.asarray(left_new, jnp.int32).reshape(n_levels, level_w, 1)
    ridx = jnp.asarray(right_new, jnp.int32).reshape(n_levels, level_w, 1)

    vmem = pl.BlockSpec(memory_space=pltpu.MemorySpace.VMEM)

    # VMEM budget hint (state table x2 + weights + index slabs + headroom),
    # capped well below every generation's physical VMEM (v7x: 64 MiB).
    needed = 4 * (2 * n_rows * LANE              # init + states tables
                  + 2 * n_levels * level_w * LANE  # index slabs (lane-padded)
                  + 2 * LANE * LANE + LANE)        # weights + bias
    vmem_limit = int(min(max(2 * needed + (2 << 20), 8 << 20), 48 << 20))

    kernel = make_tree_kernel(n_leaf_pad, level_w, n_levels, n_rows)
    states = pl.pallas_call(
        kernel,
        out_shape=jax.ShapeDtypeStruct((n_rows, LANE), jnp.float32),
        in_specs=[vmem, vmem, vmem, vmem, vmem, vmem],
        out_specs=vmem,
        compiler_params=pltpu.CompilerParams(vmem_limit_bytes=vmem_limit),
    )(lidx, ridx, init_states, wl_pad, wr_pad, b_pad)
    # TODO(synk): for many independent trees (v7x has 2 TensorCores), add a
    # leading "parallel" grid axis over batched per-tree schedules.
    return states


# ------------------------------ Python glue -------------------------------
class Node:
    def __init__(self, word=None, children=()):
        self.word = word
        self.children = list(children)


def flatten_tree(node, nodes):
    """Post-order flattening mirroring BasicRecursiveNN.recursive_forward.

    Each appended entry: (type, word, left_slot, right_slot, level).
    type 0 = leaf (level 0), type 1 = 2-child internal node.
    1-child internal nodes produce no output and pass through their child.
    Returns the slot index holding this node's state.
    """
    if len(node.children) == 0:
        idx = len(nodes)
        nodes.append((0, int(node.word), -1, -1, 0))
        return idx
    assert len(node.children) <= 2
    slots = [flatten_tree(c, nodes) for c in node.children]
    if len(slots) == 1:
        return slots[0]
    lvl = max(nodes[slots[0]][4], nodes[slots[1]][4]) + 1
    idx = len(nodes)
    nodes.append((1, 0, slots[0], slots[1], lvl))
    return idx


def build_schedule(nodes):
    """Build the level-ordered (wavefront) schedule consumed by the kernel."""
    n = len(nodes)
    leaves = [i for i in range(n) if nodes[i][0] == 0]
    internals = [i for i in range(n) if nodes[i][0] == 1]

    n_leaf_pad = _round_up(max(len(leaves), 1), 8)
    max_lvl = max((nodes[i][4] for i in internals), default=0)
    by_level = [[i for i in internals if nodes[i][4] == lvl]
                for lvl in range(1, max_lvl + 1)]
    level_w = _round_up(max((len(l) for l in by_level), default=1), 8)
    n_levels = len(by_level)

    new_row = {}
    for k, p in enumerate(leaves):
        new_row[p] = k
    for lv, lvl_nodes in enumerate(by_level):
        for k, p in enumerate(lvl_nodes):
            new_row[p] = n_leaf_pad + lv * level_w + k

    left_new = np.zeros((max(n_levels, 1) * level_w,), np.int32)
    right_new = np.zeros_like(left_new)
    for lv, lvl_nodes in enumerate(by_level):
        for k, p in enumerate(lvl_nodes):
            left_new[lv * level_w + k] = new_row[nodes[p][2]]
            right_new[lv * level_w + k] = new_row[nodes[p][3]]

    leaf_words = np.asarray([nodes[i][1] for i in leaves], np.int32)
    perm = np.asarray([new_row[p] for p in range(n)], np.int32)
    return leaf_words, left_new, right_new, perm, n_leaf_pad, level_w, n_levels


def reference_forward(root, emb, fc_w, fc_b):
    """Pure numpy replica of the PyTorch forward (for verification)."""
    outputs = []

    def rec(node):
        if len(node.children) == 0:
            e = np.asarray(emb)[int(node.word)]
            outputs.append(e)
            return e
        states = [rec(c) for c in node.children]
        if len(states) == 1:
            return states[0]
        x = np.concatenate([states[0], states[1]], 0)
        h = np.tanh(np.asarray(fc_w) @ x + np.asarray(fc_b))
        outputs.append(h)
        return h

    final_state = rec(root.children[0])
    return np.concatenate(outputs, 0), final_state


if __name__ == "__main__":
    # Model hyper-parameters (word_embed_dim == hidden_size as asserted).
    word_vocab_size = 32
    word_embed_dim = 32
    hidden_size = 32

    key = jax.random.PRNGKey(0)
    k_emb, k_w, k_b = jax.random.split(key, 3)
    emb = jax.random.normal(k_emb, (word_vocab_size, word_embed_dim), jnp.float32)
    fc_w = jax.random.normal(k_w, (hidden_size, 2 * word_embed_dim), jnp.float32) * 0.1
    fc_b = jax.random.normal(k_b, (hidden_size,), jnp.float32) * 0.1

    # Small binary parse tree: ((3 7) ((1 5) 2)), wrapped in a dummy root
    # whose children[0] is the real tree (matching forward()'s convention).
    tree = Node(children=[
        Node(children=[Node(word=3), Node(word=7)]),
        Node(children=[
            Node(children=[Node(word=1), Node(word=5)]),
            Node(word=2),
        ]),
    ])
    root = Node(children=[tree])

    node_list = []
    final_idx = flatten_tree(root.children[0], node_list)
    (leaf_words, left_new, right_new, perm,
     n_leaf_pad, level_w, n_levels) = build_schedule(node_list)

    if n_levels == 0:
        # Degenerate tree (leaves only): the forward is just an embedding gather.
        all_words = jnp.asarray([w for _, w, *_ in node_list], jnp.int32)
        states_post = jnp.take(jnp.asarray(emb, jnp.float32), all_words, axis=0)
        states_post = jax.block_until_ready(states_post)
    else:
        states_lvl = run_tree_rnn(
            jnp.asarray(leaf_words), left_new, right_new,
            n_leaf_pad, level_w, n_levels, emb, fc_w, fc_b)
        states_lvl = jax.block_until_ready(states_lvl)
        # Permute level-ordered rows back to post-order, drop lane padding.
        states_post = jnp.take(states_lvl, jnp.asarray(perm), axis=0)[:, :word_embed_dim]

    outputs = np.asarray(states_post).reshape(-1)      # == torch.cat(outputs, 0)
    final_state = np.asarray(states_post)[final_idx]   # == returned final_state

    ref_out, ref_final = reference_forward(root, emb, fc_w, fc_b)
    np.testing.assert_allclose(outputs, ref_out, rtol=1e-5, atol=1e-5)
    np.testing.assert_allclose(final_state, ref_final, rtol=1e-5, atol=1e-5)

    print("KERNEL_OK")
</pallas_src>

<mosaic_0001>
module attributes {stable_mosaic.version = 11 : i64} {
  func.func @tree_rnn_kernel(%arg0: memref<3x8x1xi32, #tpu.memory_space<vmem>>, %arg1: memref<3x8x1xi32, #tpu.memory_space<vmem>>, %arg2: memref<32x128xf32, #tpu.memory_space<vmem>>, %arg3: memref<128x128xf32, #tpu.memory_space<vmem>>, %arg4: memref<128x128xf32, #tpu.memory_space<vmem>>, %arg5: memref<1x128xf32, #tpu.memory_space<vmem>>, %arg6: memref<32x128xf32, #tpu.memory_space<vmem>>) attributes {dimension_semantics = [], scalar_prefetch = 0 : i64, scratch_operands = 0 : i64, tpu.core_type = #tpu.core_type<tc>} {
    %c0 = arith.constant 0 : index
    %c0_0 = arith.constant 0 : index
    %0 = vector.load %arg2[%c0, %c0_0] : memref<32x128xf32, #tpu.memory_space<vmem>>, vector<32x128xf32>
    %c0_1 = arith.constant 0 : index
    %c0_2 = arith.constant 0 : index
    %1 = vector.load %arg6[%c0_1, %c0_2] : memref<32x128xf32, #tpu.memory_space<vmem>>, vector<32x128xf32>
    tpu.vector_store %arg6[%c0_1, %c0_2], %0 {strides = array<i32>} : memref<32x128xf32, #tpu.memory_space<vmem>>, vector<32x128xf32>,
    %c0_3 = arith.constant 0 : index
    %c0_4 = arith.constant 0 : index
    %2 = vector.load %arg3[%c0_3, %c0_4] : memref<128x128xf32, #tpu.memory_space<vmem>>, vector<128x128xf32>
    %c0_5 = arith.constant 0 : index
    %c0_6 = arith.constant 0 : index
    %3 = vector.load %arg4[%c0_5, %c0_6] : memref<128x128xf32, #tpu.memory_space<vmem>>, vector<128x128xf32>
    %c0_7 = arith.constant 0 : index
    %c0_8 = arith.constant 0 : index
    %4 = vector.load %arg5[%c0_7, %c0_8] : memref<1x128xf32, #tpu.memory_space<vmem>>, vector<1x128xf32>
    %5 = vector.shape_cast %4 : vector<1x128xf32> to vector<1x128xf32>
    %6 = vector.broadcast %5 : vector<1x128xf32> to vector<8x128xf32>
    %7 = tpu.iota {dimensions = array<i32: 1>} : vector<8x32xi32>
    %c0_9 = arith.constant 0 : index
    %c0_10 = arith.constant 0 : index
    %c0_11 = arith.constant 0 : index
    %8 = vector.load %arg0[%c0_9, %c0_10, %c0_11] : memref<3x8x1xi32, #tpu.memory_space<vmem>>, vector<1x8x1xi32>
    %9 = vector.shape_cast %8 : vector<1x8x1xi32> to vector<8x1xi32>
    %c0_12 = arith.constant 0 : index
    %c0_13 = arith.constant 0 : index
    %c0_14 = arith.constant 0 : index
    %10 = vector.load %arg1[%c0_12, %c0_13, %c0_14] : memref<3x8x1xi32, #tpu.memory_space<vmem>>, vector<1x8x1xi32>
    %11 = vector.shape_cast %10 : vector<1x8x1xi32> to vector<8x1xi32>
    %12 = vector.broadcast %9 : vector<8x1xi32> to vector<8x32xi32>
    %13 = arith.cmpi eq, %7, %12 : vector<8x32xi32>
    %14 = arith.extui %13 : vector<8x32xi1> to vector<8x32xi32>
    %15 = arith.sitofp %14 : vector<8x32xi32> to vector<8x32xf32>
    %16 = vector.broadcast %11 : vector<8x1xi32> to vector<8x32xi32>
    %17 = arith.cmpi eq, %7, %16 : vector<8x32xi32>
    %18 = arith.extui %17 : vector<8x32xi1> to vector<8x32xi32>
    %19 = arith.sitofp %18 : vector<8x32xi32> to vector<8x32xf32>
    %c0_15 = arith.constant 0 : index
    %c0_16 = arith.constant 0 : index
    %20 = vector.load %arg6[%c0_15, %c0_16] : memref<32x128xf32, #tpu.memory_space<vmem>>, vector<32x128xf32>
    %cst = arith.constant dense<0.000000e+00> : vector<8x128xf32>
    %21 = tpu.matmul %15, %20, %cst {dimension_numbers = #tpu.dot_dimension_numbers<[1], [0], [0], [1], [0, 0, 1, 1], [], []>} : vector<8x32xf32>, vector<32x128xf32>, vector<8x128xf32> -> vector<8x128xf32>
    %cst_17 = arith.constant dense<0.000000e+00> : vector<8x128xf32>
    %22 = tpu.matmul %19, %20, %cst_17 {dimension_numbers = #tpu.dot_dimension_numbers<[1], [0], [0], [1], [0, 0, 1, 1], [], []>} : vector<8x32xf32>, vector<32x128xf32>, vector<8x128xf32> -> vector<8x128xf32>
    %cst_18 = arith.constant dense<0.000000e+00> : vector<8x128xf32>
    %23 = tpu.matmul %21, %2, %cst_18 {dimension_numbers = #tpu.dot_dimension_numbers<[1], [0], [0], [1], [0, 0, 1, 1], [], []>} : vector<8x128xf32>, vector<128x128xf32>, vector<8x128xf32> -> vector<8x128xf32>
    %cst_19 = arith.constant dense<0.000000e+00> : vector<8x128xf32>
    %24 = tpu.matmul %22, %3, %cst_19 {dimension_numbers = #tpu.dot_dimension_numbers<[1], [0], [0], [1], [0, 0, 1, 1], [], []>} : vector<8x128xf32>, vector<128x128xf32>, vector<8x128xf32> -> vector<8x128xf32>
    %25 = arith.addf %23, %24 : vector<8x128xf32>
    %26 = arith.addf %25, %6 : vector<8x128xf32>
    %27 = math.tanh %26 : vector<8x128xf32>
    %c8 = arith.constant 8 : index
    %c0_20 = arith.constant 0 : index
    %28 = vector.load %arg6[%c8, %c0_20] : memref<32x128xf32, #tpu.memory_space<vmem>>, vector<8x128xf32>
    tpu.vector_store %arg6[%c8, %c0_20], %27 {strides = array<i32>} : memref<32x128xf32, #tpu.memory_space<vmem>>, vector<8x128xf32>,
    %c1 = arith.constant 1 : index
    %c0_21 = arith.constant 0 : index
    %c0_22 = arith.constant 0 : index
    %29 = vector.load %arg0[%c1, %c0_21, %c0_22] : memref<3x8x1xi32, #tpu.memory_space<vmem>>, vector<1x8x1xi32>
    %30 = vector.shape_cast %29 : vector<1x8x1xi32> to vector<8x1xi32>
    %c1_23 = arith.constant 1 : index
    %c0_24 = arith.constant 0 : index
    %c0_25 = arith.constant 0 : index
    %31 = vector.load %arg1[%c1_23, %c0_24, %c0_25] : memref<3x8x1xi32, #tpu.memory_space<vmem>>, vector<1x8x1xi32>
    %32 = vector.shape_cast %31 : vector<1x8x1xi32> to vector<8x1xi32>
    %33 = vector.broadcast %30 : vector<8x1xi32> to vector<8x32xi32>
    %34 = arith.cmpi eq, %7, %33 : vector<8x32xi32>
    %35 = arith.extui %34 : vector<8x32xi1> to vector<8x32xi32>
    %36 = arith.sitofp %35 : vector<8x32xi32> to vector<8x32xf32>
    %37 = vector.broadcast %32 : vector<8x1xi32> to vector<8x32xi32>
    %38 = arith.cmpi eq, %7, %37 : vector<8x32xi32>
    %39 = arith.extui %38 : vector<8x32xi1> to vector<8x32xi32>
    %40 = arith.sitofp %39 : vector<8x32xi32> to vector<8x32xf32>
    %c0_26 = arith.constant 0 : index
    %c0_27 = arith.constant 0 : index
    %41 = vector.load %arg6[%c0_26, %c0_27] : memref<32x128xf32, #tpu.memory_space<vmem>>, vector<32x128xf32>
    %cst_28 = arith.constant dense<0.000000e+00> : vector<8x128xf32>
    %42 = tpu.matmul %36, %41, %cst_28 {dimension_numbers = #tpu.dot_dimension_numbers<[1], [0], [0], [1], [0, 0, 1, 1], [], []>} : vector<8x32xf32>, vector<32x128xf32>, vector<8x128xf32> -> vector<8x128xf32>
    %cst_29 = arith.constant dense<0.000000e+00> : vector<8x128xf32>
    %43 = tpu.matmul %40, %41, %cst_29 {dimension_numbers = #tpu.dot_dimension_numbers<[1], [0], [0], [1], [0, 0, 1, 1], [], []>} : vector<8x32xf32>, vector<32x128xf32>, vector<8x128xf32> -> vector<8x128xf32>
    %cst_30 = arith.constant dense<0.000000e+00> : vector<8x128xf32>
    %44 = tpu.matmul %42, %2, %cst_30 {dimension_numbers = #tpu.dot_dimension_numbers<[1], [0], [0], [1], [0, 0, 1, 1], [], []>} : vector<8x128xf32>, vector<128x128xf32>, vector<8x128xf32> -> vector<8x128xf32>
    %cst_31 = arith.constant dense<0.000000e+00> : vector<8x128xf32>
    %45 = tpu.matmul %43, %3, %cst_31 {dimension_numbers = #tpu.dot_dimension_numbers<[1], [0], [0], [1], [0, 0, 1, 1], [], []>} : vector<8x128xf32>, vector<128x128xf32>, vector<8x128xf32> -> vector<8x128xf32>
    %46 = arith.addf %44, %45 : vector<8x128xf32>
    %47 = arith.addf %46, %6 : vector<8x128xf32>
    %48 = math.tanh %47 : vector<8x128xf32>
    %c16 = arith.constant 16 : index
    %c0_32 = arith.constant 0 : index
    %49 = vector.load %arg6[%c16, %c0_32] : memref<32x128xf32, #tpu.memory_space<vmem>>, vector<8x128xf32>
    tpu.vector_store %arg6[%c16, %c0_32], %48 {strides = array<i32>} : memref<32x128xf32, #tpu.memory_space<vmem>>, vector<8x128xf32>,
    %c2 = arith.constant 2 : index
    %c0_33 = arith.constant 0 : index
    %c0_34 = arith.constant 0 : index
    %50 = vector.load %arg0[%c2, %c0_33, %c0_34] : memref<3x8x1xi32, #tpu.memory_space<vmem>>, vector<1x8x1xi32>
    %51 = vector.shape_cast %50 : vector<1x8x1xi32> to vector<8x1xi32>
    %c2_35 = arith.constant 2 : index
    %c0_36 = arith.constant 0 : index
    %c0_37 = arith.constant 0 : index
    %52 = vector.load %arg1[%c2_35, %c0_36, %c0_37] : memref<3x8x1xi32, #tpu.memory_space<vmem>>, vector<1x8x1xi32>
    %53 = vector.shape_cast %52 : vector<1x8x1xi32> to vector<8x1xi32>
    %54 = vector.broadcast %51 : vector<8x1xi32> to vector<8x32xi32>
    %55 = arith.cmpi eq, %7, %54 : vector<8x32xi32>
    %56 = arith.extui %55 : vector<8x32xi1> to vector<8x32xi32>
    %57 = arith.sitofp %56 : vector<8x32xi32> to vector<8x32xf32>
    %58 = vector.broadcast %53 : vector<8x1xi32> to vector<8x32xi32>
    %59 = arith.cmpi eq, %7, %58 : vector<8x32xi32>
    %60 = arith.extui %59 : vector<8x32xi1> to vector<8x32xi32>
    %61 = arith.sitofp %60 : vector<8x32xi32> to vector<8x32xf32>
    %c0_38 = arith.constant 0 : index
    %c0_39 = arith.constant 0 : index
    %62 = vector.load %arg6[%c0_38, %c0_39] : memref<32x128xf32, #tpu.memory_space<vmem>>, vector<32x128xf32>
    %cst_40 = arith.constant dense<0.000000e+00> : vector<8x128xf32>
    %63 = tpu.matmul %57, %62, %cst_40 {dimension_numbers = #tpu.dot_dimension_numbers<[1], [0], [0], [1], [0, 0, 1, 1], [], []>} : vector<8x32xf32>, vector<32x128xf32>, vector<8x128xf32> -> vector<8x128xf32>
    %cst_41 = arith.constant dense<0.000000e+00> : vector<8x128xf32>
    %64 = tpu.matmul %61, %62, %cst_41 {dimension_numbers = #tpu.dot_dimension_numbers<[1], [0], [0], [1], [0, 0, 1, 1], [], []>} : vector<8x32xf32>, vector<32x128xf32>, vector<8x128xf32> -> vector<8x128xf32>
    %cst_42 = arith.constant dense<0.000000e+00> : vector<8x128xf32>
    %65 = tpu.matmul %63, %2, %cst_42 {dimension_numbers = #tpu.dot_dimension_numbers<[1], [0], [0], [1], [0, 0, 1, 1], [], []>} : vector<8x128xf32>, vector<128x128xf32>, vector<8x128xf32> -> vector<8x128xf32>
    %cst_43 = arith.constant dense<0.000000e+00> : vector<8x128xf32>
    %66 = tpu.matmul %64, %3, %cst_43 {dimension_numbers = #tpu.dot_dimension_numbers<[1], [0], [0], [1], [0, 0, 1, 1], [], []>} : vector<8x128xf32>, vector<128x128xf32>, vector<8x128xf32> -> vector<8x128xf32>
    %67 = arith.addf %65, %66 : vector<8x128xf32>
    %68 = arith.addf %67, %6 : vector<8x128xf32>
    %69 = math.tanh %68 : vector<8x128xf32>
    %c24 = arith.constant 24 : index
    %c0_44 = arith.constant 0 : index
    %70 = vector.load %arg6[%c24, %c0_44] : memref<32x128xf32, #tpu.memory_space<vmem>>, vector<8x128xf32>
    tpu.vector_store %arg6[%c24, %c0_44], %69 {strides = array<i32>} : memref<32x128xf32, #tpu.memory_space<vmem>>, vector<8x128xf32>,
    return
  }
}

</mosaic_0001>

<bundles_post_ra>
// kernel: tpu_custom_call.1
= control target key start
LH: loop header
LB: loop body
LE: loop exit
PB: predicated region body
PF: predicated region fallthrough
CT: control target
= control target key end

     0   :  { %11 = vsyncpa [#allocation3], 0  ;;  %s2065_s0 = inlined_call_operand.vmem [shape: s32[3,8,1], index: 0, kind: input, shape index: {}]   ;;  %s2066_s1 = inlined_call_operand.vmem [shape: s32[3,8,1], index: 1, kind: input, shape index: {}]   ;;  %s2067_s2 = inlined_call_operand.vmem [shape: f32[32,128], index: 2, kind: input, shape index: {}]   ;;  %s2068_s3 = inlined_call_operand.hbm [shape: f32[128,128], index: 3, kind: input, shape index: {}]   ;;  %s2069_s4 = inlined_call_operand.hbm [shape: f32[128,128], index: 4, kind: input, shape index: {}]   ;;  %s2070_s5 = inlined_call_operand.vmem [shape: f32[1,128], index: 5, kind: input, shape index: {}]   ;;  %s2071_s6 = inlined_call_operand.hbm [shape: f32[32,128], index: 6, kind: output, shape index: {}]  }
   0x1   :  { %12 = vsyncpa [#allocation6], 0 }
   0x2   :  { %13 = vsyncpa [#allocation4], 0  ;;  %s1739_s21 = smov [#allocation2]   ;;  %s1667_s25 = scalar_lea.hbm %s2068_s3, 2048 }
   0x3   :  { %s25_s22 = sshll.u32 %s1739_s21, 4  ;;  %p1668_p0 = scmp.ne.s32.totalorder %s2068_s3, %s1667_s25  ;;  %s26_s22 = int_to_ptr.vmem [resolvable:$true] %s25_s22 }
   0x4   :  { %p1671_p1 = scmp.lt.u32.totalorder %s1667_s25, %s2068_s3 }
   0x6   :  { %p1673_p2 = pnand %p1671_p1, %p1668_p0 }
   0x8   :  { %1676 = shalt.err (!%p1673_p2)
}
   0x9   :  { %s1677_s30 = scalar_lea.vmem %s26_s22, 2048  ;;  %p1682_p4 = scmp.lt.s32.totalorder %s26_s22, %s26_s22 }
   0xa   :  { %p1678_p3 = scmp.ne.s32.totalorder %s26_s22, %s1677_s30  ;;  %p1683_p5 = scmp.lt.s32.totalorder %s1677_s30, %s1677_s30 }
   0xc   :  { %p1684_p6 = por %p1683_p5, %p1682_p4 }
   0xe   :  { %p1685_p7 = pnand %p1684_p6, %p1678_p3 }
  0x10   :  { %1688 = shalt.err (!%p1685_p7)
}
  0x11   :  { %s1740_s7 = smov 128   ;;  %s1741_s8 = smov 8  }
  0x12   :  { %31 = dma.hbm_to_vmem [thread:$0]  %s2068_s3, 2048, %s26_s22, [#allocation3], %s1740_s7, %s1740_s7, %s1741_s8  }
  0x13   :  { %s1742_s11 = smov [#allocation5]   ;;  %s1689_s15 = scalar_lea.hbm %s2069_s4, 2048 }
  0x14   :  { %s37_s12 = sshll.u32 %s1742_s11, 4  ;;  %p1690_p8 = scmp.ne.s32.totalorder %s2069_s4, %s1689_s15  ;;  %s38_s12 = int_to_ptr.vmem [resolvable:$true] %s37_s12 }
  0x15   :  { %p1693_p9 = scmp.lt.u32.totalorder %s1689_s15, %s2069_s4 }
  0x17   :  { %p1695_p10 = pnand %p1693_p9, %p1690_p8 }
  0x19   :  { %1698 = shalt.err (!%p1695_p10)
}
  0x1a   :  { %s1699_s20 = scalar_lea.vmem %s38_s12, 2048  ;;  %p1704_p12 = scmp.lt.s32.totalorder %s38_s12, %s38_s12 }
  0x1b   :  { %p1700_p11 = scmp.ne.s32.totalorder %s38_s12, %s1699_s20  ;;  %p1705_p13 = scmp.lt.s32.totalorder %s1699_s20, %s1699_s20 }
  0x1d   :  { %p1706_p0 = por %p1705_p13, %p1704_p12 }
  0x1f   :  { %p1707_p1 = pnand %p1706_p0, %p1700_p11 }
  0x21   :  { %1710 = shalt.err (!%p1707_p1)
}
  0x22   :  { %43 = dma.hbm_to_vmem [thread:$0]  %s2069_s4, 2048, %s38_s12, [#allocation6], %s1740_s7, %s1740_s7, %s1741_s8  }
  0x23   :  { %1733 = dma.done.wait [#allocation3], 2048  }
  0x24   :  { %1734 = vsyncadd [#allocation3], 4294965248 }
  0x25   :  { %1735 = dma.done.wait [#allocation6], 2048  }
  0x26   :  { %1736 = vsyncadd [#allocation6], 4294965248  ;;  %v1743_v0 = vmov 0   ;;  %v1744_v1 = vmov 0.0|0.0   ;;  %v101_v2 = vld [vmem:[%s2065_s0] sm:$0xff]  ;;  %v53_v4 = vld [vmem:[%s2067_s2 + $0x8] sm:$0xff]  ;;  %v99_v12 = vlaneseq }
  0x27   :  { %1659 = vset.pattern.permute.xlu0 %v1743_v0  ;;  %1470 = vmatprep.subr.bf16.mxu0 %v1744_v1  ;;  %v1821_v3 = vld [vmem:[%s2067_s2] sm:$0xff]  ;;  %v54_v5 = vld [vmem:[%s2067_s2 + $0x10] sm:$0xff]  ;;  %v1837_v8 = vld [vmem:[%s2067_s2 + $0x18] sm:$0xff]  ;;  %vm1745_vm0 = vmmov 0   ;;  %v1746_v9 = vmov 0.0   ;;  %vm119_vm1 = vcmask 261120  }
  0x28   :  { %1476 = vmatprep.subr.bf16.mxu1 %v1744_v1  ;;  %1660 = vset.pattern.permute.xlu1 %v1743_v0  ;;  %v102_v6 = vld [vmem:[%s2066_s1] sm:$0xff]  ;;  %56 = vst [vmem:[#allocation7] sm:$0xff] %v1821_v3  ;;  %v1471_v7 = vpack.c.bf16 %v53_v4, %v1821_v3  ;;  %v1844_v10 = vpack.c.bf16 %v1837_v8, %v54_v5  ;;  %v1056_v11 = vld [vmem:[%s2065_s0 + $0x10] sm:$0xff]  ;;  %v1855_v13 = vand.u32 127, %v99_v12  ;;  %v76_v14 = vld [vmem:[#allocation5] sm:$0xff] }
  0x29   :  { %104 = vperm.xlu0 %1659, %v101_v2   ;;  %1202 = vmatprep.mubr.msk.f32.mxu0 %vm1745_vm0, %v1746_v9  ;;  %v77_v15 = vld [vmem:[#allocation5 + $0x8] sm:$0xff]  ;;  %v60_v17 = vld [vmem:[#allocation2] sm:$0xff]  ;;  %v78_v20 = vld [vmem:[#allocation5 + $0x10] sm:$0xff] }
  0x2a   :  { %1213 = vmatprep.mubr.msk.f32.mxu1 %vm1745_vm0, %v1746_v9  ;;  %1472 = vmatpush3.bf16.msra.mxu0 %v1471_v7  ;;  %v1857_v18 = vpack.c.bf16 %v77_v15, %v76_v14  ;;  %v61_v19 = vld [vmem:[#allocation2 + $0x8] sm:$0xff]  ;;  %v79_v21 = vld [vmem:[#allocation5 + $0x18] sm:$0xff]  ;;  %v62_v25 = vld [vmem:[#allocation2 + $0x10] sm:$0xff] }
  0x2b   :  { %1478 = vmatpush3.bf16.msra.mxu1 %v1471_v7  ;;  %1473 = vmatprep.subr.bf16.mxu0 %v1744_v1  ;;  %v1862_v24 = vpack.c.bf16 %v61_v19, %v60_v17  ;;  %v1865_v26 = vpack.c.bf16 %v79_v21, %v78_v20  ;;  %v63_v27 = vld [vmem:[#allocation2 + $0x18] sm:$0xff]  ;;  %v80_v28 = vld [vmem:[#allocation5 + $0x20] sm:$0xff]  ;;  %v81_v29 = vld [vmem:[#allocation5 + $0x28] sm:$0xff] }
  0x2c   :  { %1479 = vmatprep.subr.bf16.mxu1 %v1744_v1  ;;  %v1874_v31 = vpack.c.bf16 %v63_v27, %v62_v25  ;;  %v64_v32 = vld [vmem:[#allocation2 + $0x20] sm:$0xff]  ;;  %v1877_v33 = vpack.c.bf16 %v81_v29, %v80_v28  ;;  %v65_v34 = vld [vmem:[#allocation2 + $0x28] sm:$0xff]  ;;  %v82_v35 = vld [vmem:[#allocation5 + $0x30] sm:$0xff] }
  0x2d   :  { %110 = vperm.xlu0 %1659, %v102_v6   ;;  %v83_v36 = vld [vmem:[#allocation5 + $0x38] sm:$0xff]  ;;  %v1884_v37 = vpack.c.bf16 %v65_v34, %v64_v32  ;;  %v66_v38 = vld [vmem:[#allocation2 + $0x30] sm:$0xff]  ;;  %v84_v41 = vld [vmem:[#allocation5 + $0x40] sm:$0xff] }
  0x2e   :  { %1475 = vmatpush3.bf16.msra.mxu0 %v1844_v10  ;;  %v1887_v39 = vpack.c.bf16 %v83_v36, %v82_v35  ;;  %v67_v40 = vld [vmem:[#allocation2 + $0x38] sm:$0xff]  ;;  %v85_v42 = vld [vmem:[#allocation5 + $0x48] sm:$0xff]  ;;  %v68_v44 = vld [vmem:[#allocation2 + $0x40] sm:$0xff] }
  0x2f   :  { %1481 = vmatpush3.bf16.msra.mxu1 %v1844_v10  ;;  %1482 = vmatprep.subr.bf16.mxu0 %v1744_v1  ;;  %v1892_v43 = vpack.c.bf16 %v67_v40, %v66_v38  ;;  %v1895_v45 = vpack.c.bf16 %v85_v42, %v84_v41  ;;  %v69_v46 = vld [vmem:[#allocation2 + $0x48] sm:$0xff]  ;;  %v86_v47 = vld [vmem:[#allocation5 + $0x50] sm:$0xff]  ;;  %v87_v48 = vld [vmem:[#allocation5 + $0x58] sm:$0xff] }
  0x30   :  { %1506 = vmatprep.subr.bf16.mxu1 %v1744_v1  ;;  %v1900_v49 = vpack.c.bf16 %v69_v46, %v68_v44  ;;  %v70_v50 = vld [vmem:[#allocation2 + $0x50] sm:$0xff]  ;;  %v1903_v51 = vpack.c.bf16 %v87_v48, %v86_v47  ;;  %v71_v52 = vld [vmem:[#allocation2 + $0x58] sm:$0xff]  ;;  %v88_v53 = vld [vmem:[#allocation5 + $0x60] sm:$0xff] }
  0x31   :  { %723 = vperm.xlu0 %1659, %v1056_v11   ;;  %v89_v54 = vld [vmem:[#allocation5 + $0x68] sm:$0xff]  ;;  %v1908_v55 = vpack.c.bf16 %v71_v52, %v70_v50  ;;  %v72_v57 = vld [vmem:[#allocation2 + $0x60] sm:$0xff]  ;;  %v74_v60 = vld [vmem:[#allocation2 + $0x70] sm:$0xff] }
  0x32   :  { %v1911_v56 = vpack.c.bf16 %v89_v54, %v88_v53  ;;  %v73_v58 = vld [vmem:[#allocation2 + $0x68] sm:$0xff]  ;;  %v75_v61 = vld [vmem:[#allocation2 + $0x78] sm:$0xff]  ;;  %v90_v63 = vld [vmem:[#allocation5 + $0x70] sm:$0xff] }
  0x33   :  { %v1916_v59 = vpack.c.bf16 %v73_v58, %v72_v57  ;;  %v1922_v62 = vpack.c.bf16 %v75_v61, %v74_v60  ;;  %v91_v0 = vld [vmem:[#allocation5 + $0x78] sm:$0xff]  ;;  %v1050_v4 = vld [vmem:[%s2065_s0 + $0x8] sm:$0xff]  ;;  %v1947_v17 = vld [vmem:[%s2070_s5] ss:$0 sm:$0xff] }
  0x34   :  { %v1927_v2 = vpack.c.bf16 %v91_v0, %v90_v63  ;;  %414 = vperm.xlu1 %1660, %v1050_v4   ;;  %v1051_v5 = vld [vmem:[%s2066_s1 + $0x8] sm:$0xff]  ;;  %v1057_v6 = vld [vmem:[%s2066_s1 + $0x10] sm:$0xff]  ;;  %s1747_s1 = smov [#allocation7]  }
  0x35   :  { %s1032_s5 = sshll.u32 %s1747_s1, 4  ;;  %s1033_s5 = int_to_ptr.vmem [resolvable:$true] %s1032_s5 }
  0x36   :  { %s1711_s19 = scalar_lea.vmem %s1033_s5, 512  ;;  %p1716_p3 = scmp.lt.s32.totalorder %s1033_s5, %s1033_s5 }
  0x37   :  { %p1712_p2 = scmp.ne.s32.totalorder %s1033_s5, %s1711_s19  ;;  %p1717_p4 = scmp.lt.s32.totalorder %s1711_s19, %s1711_s19 }
  0x38   :  { %420 = vperm.xlu1 %1660, %v1051_v5  }
  0x39   :  { %p1718_p5 = por %p1717_p4, %p1716_p3 }
  0x3b   :  { %p1719_p6 = pnand %p1718_p5, %p1712_p2 }
  0x3c   :  { %729 = vperm.xlu1 %1660, %v1057_v6  }
  0xa8   :  { %v105_v16 = vpop.permute.xlu0 %104 }
  0xa9   :  { %vm106_vm2 = vcmp.eq.s32.totalorder %v1855_v13, %v105_v16 }
  0xaa   :  { %v1046_v22 = vsel %vm106_vm2, 1.0, %v1746_v9 }
  0xab   :  { %1203 = vmatmul.mubr.msk.f32.vlgmr.msra.gmra.mrb[0].mxu0 %vm119_vm1, %v1046_v22 }
  0xac   :  { %v111_v23 = vpop.permute.xlu0 %110  ;;  %1484 = vmatpush3.bf16.msra.mxu0 %v1857_v18  ;;  %1248 = vmatprep.mubr.msk.f32.mxu0 %vm1745_vm0, %v1746_v9 }
  0xad   :  { %vm112_vm3 = vcmp.eq.s32.totalorder %v1855_v13, %v111_v23  ;;  %1485 = vmatprep.subr.bf16.mxu0 %v1744_v1 }
  0xae   :  { %v1047_v30 = vsel %vm112_vm3, 1.0, %v1746_v9 }
  0xaf   :  { %1214 = vmatmul.mubr.msk.f32.vlgmr.msra.gmra.mrb[0].mxu1 %vm119_vm1, %v1047_v30 }
  0xb0   :  { %1508 = vmatpush3.bf16.msra.mxu1 %v1862_v24  ;;  %1487 = vmatpush3.bf16.msra.mxu0 %v1865_v26  ;;  %v724_v44 = vpop.permute.xlu0 %723 }
  0xb1   :  { %1509 = vmatprep.subr.bf16.mxu1 %v1744_v1  ;;  %1488 = vmatprep.subr.bf16.mxu0 %v1744_v1  ;;  %vm725_vm6 = vcmp.eq.s32.totalorder %v1855_v13, %v724_v44 }
  0xb2   :  { %1283 = vmatprep.mubr.msk.f32.mxu1 %vm1745_vm0, %v1746_v9  ;;  %v1058_v50 = vsel %vm725_vm6, 1.0, %v1746_v9 }
  0xb3   :  { %v415_v23 = vpop.permute.xlu1 %414 }
  0xb4   :  { %1511 = vmatpush3.bf16.msra.mxu1 %v1874_v31  ;;  %1490 = vmatpush3.bf16.msra.mxu0 %v1877_v33  ;;  %vm416_vm4 = vcmp.eq.s32.totalorder %v1855_v13, %v415_v23 }
  0xb5   :  { %1512 = vmatprep.subr.bf16.mxu1 %v1744_v1  ;;  %1491 = vmatprep.subr.bf16.mxu0 %v1744_v1 }
  0xb7   :  { %v421_v28 = vpop.permute.xlu1 %420 }
  0xb8   :  { %1514 = vmatpush3.bf16.msra.mxu1 %v1884_v37  ;;  %1493 = vmatpush3.bf16.msra.mxu0 %v1887_v39  ;;  %vm422_vm5 = vcmp.eq.s32.totalorder %v1855_v13, %v421_v28 }
  0xb9   :  { %1515 = vmatprep.subr.bf16.mxu1 %v1744_v1  ;;  %1494 = vmatprep.subr.bf16.mxu0 %v1744_v1  ;;  %v1053_v29 = vsel %vm422_vm5, 1.0, %v1746_v9 }
  0xbb   :  { %v730_v46 = vpop.permute.xlu1 %729 }
  0xbc   :  { %1517 = vmatpush3.bf16.msra.mxu1 %v1892_v43  ;;  %1496 = vmatpush3.bf16.msra.mxu0 %v1895_v45  ;;  %vm731_vm7 = vcmp.eq.s32.totalorder %v1855_v13, %v730_v46 }
  0xbd   :  { %1518 = vmatprep.subr.bf16.mxu1 %v1744_v1  ;;  %1497 = vmatprep.subr.bf16.mxu0 %v1744_v1  ;;  %v1059_v52 = vsel %vm731_vm7, 1.0, %v1746_v9 }
  0xc0   :  { %1520 = vmatpush3.bf16.msra.mxu1 %v1900_v49  ;;  %1499 = vmatpush3.bf16.msra.mxu0 %v1903_v51 }
  0xc1   :  { %1521 = vmatprep.subr.bf16.mxu1 %v1744_v1  ;;  %1500 = vmatprep.subr.bf16.mxu0 %v1744_v1 }
  0xc4   :  { %1523 = vmatpush3.bf16.msra.mxu1 %v1908_v55  ;;  %1502 = vmatpush3.bf16.msra.mxu0 %v1911_v56 }
  0xc5   :  { %1524 = vmatprep.subr.bf16.mxu1 %v1744_v1  ;;  %1503 = vmatprep.subr.bf16.mxu0 %v1744_v1 }
  0xc8   :  { %1526 = vmatpush3.bf16.msra.mxu1 %v1916_v59  ;;  %1505 = vmatpush3.bf16.msra.mxu0 %v1927_v2 }
  0xc9   :  { %1527 = vmatprep.subr.bf16.mxu1 %v1744_v1  ;;  %1530 = vmatprep.subr.bf16.mxu0 %v1744_v1 }
  0xcc   :  { %1529 = vmatpush3.bf16.msra.mxu1 %v1922_v62 }
  0xcd   :  { %1536 = vmatprep.subr.bf16.mxu1 %v1744_v1 }
 0x17e   :  { %v189_v7 = vpop.f32.mrb[0].mxu0 }
 0x17f   :  { %v1204_v11 = vpop.f32.mrb[1].mxu0  ;;  %1284 = vmatmul.mubr.f32.vlgmr.msra.gmra.mrb[2].mxu1 %v189_v7 }
 0x180   :  { %1305 = vmatprep.mubr.msk.f32.mxu1 %vm1745_vm0, %v1746_v9 }
 0x182   :  { %v262_v12 = vpop.f32.mrb[0].mxu1 }
 0x183   :  { %v1215_v14 = vpop.f32.mrb[1].mxu1  ;;  %1249 = vmatmul.mubr.f32.vlgmr.msra.gmra.mrb[2].mxu0 %v262_v12 }
 0x184   :  { %1294 = vmatprep.mubr.msk.f32.mxu0 %vm1745_vm0, %v1746_v9 }
 0x252   :  { %v402_v15 = vpop.f32.mrb[2].mxu1 }
 0x253   :  { %v1285_v16 = vpop.f32.mrb[3].mxu1 }
 0x256   :  { %v332_v19 = vpop.f32.mrb[2].mxu0 }
 0x257   :  { %v403_v20 = vadd.f32 %v402_v15, %v332_v19  ;;  %v1250_v21 = vpop.f32.mrb[3].mxu0 }
 0x259   :  { %v406_v22 = vadd.f32 %v1947_v17, %v403_v20 }
 0x25b   :  { %1661 = vtanh.f32 %v406_v22 }
 0x265   :  { %v1662_v25 = vpop.eup %1661 }
 0x266   :  { %408 = vst [vmem:[#allocation7 + $0x8] sm:$0xff] %v1662_v25  ;;  %v1531_v27 = vpack.c.bf16 %v1662_v25, %v1821_v3  ;;  %v1052_v3 = vsel %vm416_vm4, 1.0, %v1746_v9 }
 0x268   :  { %1532 = vmatpush3.bf16.msra.mxu0 %v1531_v27  ;;  %1538 = vmatpush3.bf16.msra.mxu1 %v1531_v27 }
 0x269   :  { %1533 = vmatprep.subr.bf16.mxu0 %v1744_v1  ;;  %1539 = vmatprep.subr.bf16.mxu1 %v1744_v1 }
 0x26c   :  { %1535 = vmatpush3.bf16.msra.mxu0 %v1844_v10  ;;  %1541 = vmatpush3.bf16.msra.mxu1 %v1844_v10 }
 0x26d   :  { %1542 = vmatprep.subr.bf16.mxu0 %v1744_v1  ;;  %1566 = vmatprep.subr.bf16.mxu1 %v1744_v1 }
 0x26f   :  { %1295 = vmatmul.mubr.msk.f32.vlgmr.msra.gmra.mrb[4].mxu0 %vm119_vm1, %v1052_v3  ;;  %1306 = vmatmul.mubr.msk.f32.vlgmr.msra.gmra.mrb[4].mxu1 %vm119_vm1, %v1053_v29 }
 0x270   :  { %1544 = vmatpush3.bf16.msra.mxu0 %v1857_v18  ;;  %1568 = vmatpush3.bf16.msra.mxu1 %v1862_v24 }
 0x271   :  { %1545 = vmatprep.subr.bf16.mxu0 %v1744_v1  ;;  %1569 = vmatprep.subr.bf16.mxu1 %v1744_v1 }
 0x272   :  { %1340 = vmatprep.mubr.msk.f32.mxu0 %vm1745_vm0, %v1746_v9  ;;  %1375 = vmatprep.mubr.msk.f32.mxu1 %vm1745_vm0, %v1746_v9 }
 0x274   :  { %1547 = vmatpush3.bf16.msra.mxu0 %v1865_v26  ;;  %1571 = vmatpush3.bf16.msra.mxu1 %v1874_v31 }
 0x275   :  { %1548 = vmatprep.subr.bf16.mxu0 %v1744_v1  ;;  %1572 = vmatprep.subr.bf16.mxu1 %v1744_v1 }
 0x278   :  { %1550 = vmatpush3.bf16.msra.mxu0 %v1877_v33  ;;  %1574 = vmatpush3.bf16.msra.mxu1 %v1884_v37 }
 0x279   :  { %1551 = vmatprep.subr.bf16.mxu0 %v1744_v1  ;;  %1575 = vmatprep.subr.bf16.mxu1 %v1744_v1 }
 0x27c   :  { %1553 = vmatpush3.bf16.msra.mxu0 %v1887_v39  ;;  %1577 = vmatpush3.bf16.msra.mxu1 %v1892_v43 }
 0x27d   :  { %1554 = vmatprep.subr.bf16.mxu0 %v1744_v1  ;;  %1578 = vmatprep.subr.bf16.mxu1 %v1744_v1 }
 0x280   :  { %1556 = vmatpush3.bf16.msra.mxu0 %v1895_v45  ;;  %1580 = vmatpush3.bf16.msra.mxu1 %v1900_v49 }
 0x281   :  { %1557 = vmatprep.subr.bf16.mxu0 %v1744_v1  ;;  %1581 = vmatprep.subr.bf16.mxu1 %v1744_v1 }
 0x284   :  { %1559 = vmatpush3.bf16.msra.mxu0 %v1903_v51  ;;  %1583 = vmatpush3.bf16.msra.mxu1 %v1908_v55 }
 0x285   :  { %1560 = vmatprep.subr.bf16.mxu0 %v1744_v1  ;;  %1584 = vmatprep.subr.bf16.mxu1 %v1744_v1 }
 0x288   :  { %1562 = vmatpush3.bf16.msra.mxu0 %v1911_v56  ;;  %1586 = vmatpush3.bf16.msra.mxu1 %v1916_v59 }
 0x289   :  { %1563 = vmatprep.subr.bf16.mxu0 %v1744_v1  ;;  %1587 = vmatprep.subr.bf16.mxu1 %v1744_v1 }
 0x28c   :  { %1565 = vmatpush3.bf16.msra.mxu0 %v1927_v2  ;;  %1589 = vmatpush3.bf16.msra.mxu1 %v1922_v62 }
 0x28d   :  { %1590 = vmatprep.subr.bf16.mxu0 %v1744_v1  ;;  %1596 = vmatprep.subr.bf16.mxu1 %v1744_v1 }
 0x342   :  { %v498_v10 = vpop.f32.mrb[4].mxu0  ;;  %v571_v30 = vpop.f32.mrb[4].mxu1 }
 0x343   :  { %v1296_v32 = vpop.f32.mrb[5].mxu0  ;;  %v1307_v34 = vpop.f32.mrb[5].mxu1  ;;  %1341 = vmatmul.mubr.f32.vlgmr.msra.gmra.mrb[6].mxu0 %v571_v30  ;;  %1376 = vmatmul.mubr.f32.vlgmr.msra.gmra.mrb[6].mxu1 %v498_v10 }
 0x344   :  { %1592 = vmatpush3.bf16.msra.mxu0 %v1531_v27  ;;  %1598 = vmatpush3.bf16.msra.mxu1 %v1531_v27 }
 0x345   :  { %1593 = vmatprep.subr.bf16.mxu0 %v1744_v1  ;;  %1599 = vmatprep.subr.bf16.mxu1 %v1744_v1 }
 0x346   :  { %1386 = vmatprep.mubr.msk.f32.mxu0 %vm1745_vm0, %v1746_v9  ;;  %1397 = vmatprep.mubr.msk.f32.mxu1 %vm1745_vm0, %v1746_v9 }
 0x416   :  { %v641_v35 = vpop.f32.mrb[6].mxu0  ;;  %v711_v36 = vpop.f32.mrb[6].mxu1 }
 0x417   :  { %v712_v38 = vadd.f32 %v711_v36, %v641_v35  ;;  %v1342_v40 = vpop.f32.mrb[7].mxu0  ;;  %v1377_v41 = vpop.f32.mrb[7].mxu1 }
 0x419   :  { %v715_v42 = vadd.f32 %v1947_v17, %v712_v38 }
 0x41b   :  { %1663 = vtanh.f32 %v715_v42 }
 0x425   :  { %v1664_v47 = vpop.eup %1663 }
 0x426   :  { %717 = vst [vmem:[#allocation7 + $0x10] sm:$0xff] %v1664_v47  ;;  %v1594_v48 = vpack.c.bf16 %v1837_v8, %v1664_v47 }
 0x428   :  { %1595 = vmatpush3.bf16.msra.mxu0 %v1594_v48  ;;  %1601 = vmatpush3.bf16.msra.mxu1 %v1594_v48 }
 0x429   :  { %1602 = vmatprep.subr.bf16.mxu0 %v1744_v1  ;;  %1626 = vmatprep.subr.bf16.mxu1 %v1744_v1 }
 0x42b   :  { %1387 = vmatmul.mubr.msk.f32.vlgmr.msra.gmra.mrb[8].mxu0 %vm119_vm1, %v1058_v50  ;;  %1398 = vmatmul.mubr.msk.f32.vlgmr.msra.gmra.mrb[8].mxu1 %vm119_vm1, %v1059_v52 }
 0x42c   :  { %1604 = vmatpush3.bf16.msra.mxu0 %v1857_v18  ;;  %1628 = vmatpush3.bf16.msra.mxu1 %v1862_v24 }
 0x42d   :  { %1605 = vmatprep.subr.bf16.mxu0 %v1744_v1  ;;  %1629 = vmatprep.subr.bf16.mxu1 %v1744_v1 }
 0x42e   :  { %1432 = vmatprep.mubr.msk.f32.mxu0 %vm1745_vm0, %v1746_v9  ;;  %1467 = vmatprep.mubr.msk.f32.mxu1 %vm1745_vm0, %v1746_v9 }
 0x430   :  { %1607 = vmatpush3.bf16.msra.mxu0 %v1865_v26  ;;  %1631 = vmatpush3.bf16.msra.mxu1 %v1874_v31 }
 0x431   :  { %1608 = vmatprep.subr.bf16.mxu0 %v1744_v1  ;;  %1632 = vmatprep.subr.bf16.mxu1 %v1744_v1 }
 0x434   :  { %1610 = vmatpush3.bf16.msra.mxu0 %v1877_v33  ;;  %1634 = vmatpush3.bf16.msra.mxu1 %v1884_v37 }
 0x435   :  { %1611 = vmatprep.subr.bf16.mxu0 %v1744_v1  ;;  %1635 = vmatprep.subr.bf16.mxu1 %v1744_v1 }
 0x438   :  { %1613 = vmatpush3.bf16.msra.mxu0 %v1887_v39  ;;  %1637 = vmatpush3.bf16.msra.mxu1 %v1892_v43 }
 0x439   :  { %1614 = vmatprep.subr.bf16.mxu0 %v1744_v1  ;;  %1638 = vmatprep.subr.bf16.mxu1 %v1744_v1 }
 0x43c   :  { %1616 = vmatpush3.bf16.msra.mxu0 %v1895_v45  ;;  %1640 = vmatpush3.bf16.msra.mxu1 %v1900_v49 }
 0x43d   :  { %1617 = vmatprep.subr.bf16.mxu0 %v1744_v1  ;;  %1641 = vmatprep.subr.bf16.mxu1 %v1744_v1 }
 0x440   :  { %1619 = vmatpush3.bf16.msra.mxu0 %v1903_v51  ;;  %1643 = vmatpush3.bf16.msra.mxu1 %v1908_v55 }
 0x441   :  { %1620 = vmatprep.subr.bf16.mxu0 %v1744_v1  ;;  %1644 = vmatprep.subr.bf16.mxu1 %v1744_v1 }
 0x444   :  { %1622 = vmatpush3.bf16.msra.mxu0 %v1911_v56  ;;  %1646 = vmatpush3.bf16.msra.mxu1 %v1916_v59 }
 0x445   :  { %1623 = vmatprep.subr.bf16.mxu0 %v1744_v1  ;;  %1647 = vmatprep.subr.bf16.mxu1 %v1744_v1 }
 0x448   :  { %1625 = vmatpush3.bf16.msra.mxu0 %v1927_v2  ;;  %1649 = vmatpush3.bf16.msra.mxu1 %v1922_v62 }
 0x4fe   :  { %v807_v8 = vpop.f32.mrb[8].mxu0  ;;  %v880_v9 = vpop.f32.mrb[8].mxu1 }
 0x4ff   :  { %v1388_v13 = vpop.f32.mrb[9].mxu0  ;;  %v1399_v18 = vpop.f32.mrb[9].mxu1  ;;  %1433 = vmatmul.mubr.f32.vlgmr.msra.gmra.mrb[10].mxu0 %v880_v9  ;;  %1468 = vmatmul.mubr.f32.vlgmr.msra.gmra.mrb[10].mxu1 %v807_v8 }
 0x5d2   :  { %v950_v24 = vpop.f32.mrb[10].mxu0  ;;  %v1020_v26 = vpop.f32.mrb[10].mxu1 }
 0x5d3   :  { %v1021_v31 = vadd.f32 %v1020_v26, %v950_v24  ;;  %v1434_v33 = vpop.f32.mrb[11].mxu0  ;;  %v1469_v37 = vpop.f32.mrb[11].mxu1 }
 0x5d5   :  { %v1024_v39 = vadd.f32 %v1947_v17, %v1021_v31 }
 0x5d7   :  { %1665 = vtanh.f32 %v1024_v39 }
 0x5e1   :  { %v1666_v1 = vpop.eup %1665 }
 0x5e2   :  { %1026 = vst [vmem:[#allocation7 + $0x18] sm:$0xff] %v1666_v1 }
 0x5e3   :  { %1722 = shalt.err (!%p1719_p6)
}
 0x5e4   :  { %s1723_s21 = scalar_lea.hbm %s2071_s6, 512 }
 0x5e5   :  { %p1724_p7 = scmp.ne.s32.totalorder %s2071_s6, %s1723_s21  ;;  %p1727_p8 = scmp.lt.u32.totalorder %s1723_s21, %s2071_s6 }
 0x5e7   :  { %p1729_p9 = pnand %p1727_p8, %p1724_p7 }
 0x5e9   :  { %1732 = shalt.err (!%p1729_p9)
}
 0x5ea   :  { %1038 = dma.vmem_to_hbm [thread:$0]  %s1033_s5, 512, %s2071_s6, [#allocation4], %s1740_s7, %s1740_s7, %s1741_s8  }
 0x5eb   :  { %1737 = dma.done.wait [#allocation4], 512  }
 0x5ec   :  { %1738 = vsyncadd [#allocation4], 4294966784 }
 0x5ed   :  { %1042 = vsyncpa [#allocation3], 1 }
 0x5ee   :  { %1043 = vsyncpa [#allocation6], 1 }
 0x5ef   :  { %1044 = vsyncpa [#allocation4], 1 }

</bundles_post_ra>
